<compile_context>
chip_gen: v7x
topology: tpu7x:2x2x1
jax: 0.10.0
libtpu: 0.0.40
codegen_flags: <defaults>
</compile_context>

<pallas_src>
import jax
import jax.numpy as jnp
from jax.experimental import pallas as pl
from jax.experimental.pallas import tpu as pltpu


# -------------------- Pallas kernels --------------------

def _mlp_chain(x, w1_ref, b1_ref, w2_ref, b2_ref, w3_ref, b3_ref):
    """fc1 -> fc2 -> fc3, MXU matmuls in the weights' dtype, f32 accumulation."""
    cd = w1_ref.dtype  # compute dtype (bf16 or f32)
    h = jnp.dot(x, w1_ref[...], preferred_element_type=jnp.float32) + b1_ref[...]
    h = jnp.dot(h.astype(cd), w2_ref[...], preferred_element_type=jnp.float32) + b2_ref[...]
    h = jnp.dot(h.astype(cd), w3_ref[...], preferred_element_type=jnp.float32) + b3_ref[...]
    return h  # (TILE_B, C) float32


def mlp_kernel(x_ref, w1_ref, b1_ref, w2_ref, b2_ref, w3_ref, b3_ref, out_ref):
    logits = _mlp_chain(x_ref[...], w1_ref, b1_ref, w2_ref, b2_ref, w3_ref, b3_ref)
    out_ref[...] = logits.astype(out_ref.dtype)


def mlp_loss_kernel(x_ref, w1_ref, b1_ref, w2_ref, b2_ref, w3_ref, b3_ref,
                    sim_ref, out_ref, loss_part_ref):
    logits = _mlp_chain(x_ref[...], w1_ref, b1_ref, w2_ref, b2_ref, w3_ref, b3_ref)
    out_ref[...] = logits.astype(out_ref.dtype)

    # log_softmax(out, dim=-1) in f32 on the freshly produced logits.
    m = jnp.max(logits, axis=-1, keepdims=True)
    lse = jnp.log(jnp.sum(jnp.exp(logits - m), axis=-1, keepdims=True)) + m
    logp = logits - lse

    # pred * similarity_matrix[target]; padded rows have zero sim rows.
    weighted = logp * sim_ref[...].astype(jnp.float32)          # (TILE_B, C)
    partial = jnp.sum(weighted)                                 # scalar: this tile's sum
    loss_part_ref[...] = jnp.full(loss_part_ref.shape, partial, dtype=loss_part_ref.dtype)


# -------------------- wrapper --------------------

def _round_up(n, m):
    return ((n + m - 1) // m) * m


def clap_classifier_forward(x, params, similarity_matrix, y=None,
                            compute_dtype=jnp.bfloat16):
    """Mirrors CLAPClassifier.forward.  x: (B, 1, 512)."""
    w1, b1, w2, b2, w3, b3 = params
    out_emb = jnp.squeeze(x, axis=1).astype(jnp.float32)        # (B, 512)  glue
    B, IN = out_emb.shape
    L1 = w1.shape[1]
    L2 = w2.shape[1]
    C = w3.shape[1]

    TILE_B = min(512, _round_up(B, 8))
    B_pad = _round_up(B, TILE_B)
    num_tiles = B_pad // TILE_B

    x_p = out_emb
    if B_pad != B:
        x_p = jnp.pad(out_emb, ((0, B_pad - B), (0, 0)))
    x_p = x_p.astype(compute_dtype)

    # MXU operands in compute_dtype; biases stay f32.
    w1c = w1.astype(compute_dtype)
    w2c = w2.astype(compute_dtype)
    w3c = w3.astype(compute_dtype)
    b1f = b1.astype(jnp.float32)
    b2f = b2.astype(jnp.float32)
    b3f = b3.astype(jnp.float32)

    x_spec = pl.BlockSpec((TILE_B, IN), lambda i: (i, 0))
    w_specs = [
        pl.BlockSpec((IN, L1), lambda i: (0, 0)),
        pl.BlockSpec((1, L1), lambda i: (0, 0)),
        pl.BlockSpec((L1, L2), lambda i: (0, 0)),
        pl.BlockSpec((1, L2), lambda i: (0, 0)),
        pl.BlockSpec((L2, C), lambda i: (0, 0)),
        pl.BlockSpec((1, C), lambda i: (0, 0)),
    ]
    logits_spec = pl.BlockSpec((TILE_B, C), lambda i: (i, 0))
    cparams = pltpu.CompilerParams(dimension_semantics=("parallel",))

    if y is None:
        logits_p = pl.pallas_call(
            mlp_kernel,
            grid=(num_tiles,),
            out_shape=jax.ShapeDtypeStruct((B_pad, C), jnp.float32),
            in_specs=[x_spec] + w_specs,
            out_specs=logits_spec,
            compiler_params=cparams,
        )(x_p, w1c, b1f, w2c, b2f, w3c, b3f)
        return logits_p[:B]

    # glue: gather similarity rows (padded rows -> zeros so they add nothing).
    sim_rows = similarity_matrix[y].astype(jnp.float32)          # (B, C)
    sim_rows_p = sim_rows
    if B_pad != B:
        sim_rows_p = jnp.pad(sim_rows, ((0, B_pad - B), (0, 0)))
    sim_spec = pl.BlockSpec((TILE_B, C), lambda i: (i, 0))
    loss_spec = pl.BlockSpec((1, 1, 128), lambda i: (i, 0, 0))

    logits_p, loss_parts = pl.pallas_call(
        mlp_loss_kernel,
        grid=(num_tiles,),
        out_shape=(jax.ShapeDtypeStruct((B_pad, C), jnp.float32),
                   jax.ShapeDtypeStruct((num_tiles, 1, 128), jnp.float32)),
        in_specs=[x_spec] + w_specs + [sim_spec],
        out_specs=(logits_spec, loss_spec),
        compiler_params=cparams,
    )(x_p, w1c, b1f, w2c, b2f, w3c, b3f, sim_rows_p)

    # glue: mean over true batch, negate, normalize by sum(sum(similarity_matrix)).
    total = jnp.sum(similarity_matrix)
    loss = -(jnp.sum(loss_parts[:, 0, 0]) / B) / total
    return loss, logits_p[:B]


# -------------------- reference (pure JAX) for verification --------------------

def _reference(x, params, similarity_matrix, y):
    w1, b1, w2, b2, w3, b3 = params
    out = jnp.squeeze(x, axis=1)
    out = out @ w1 + b1
    out = out @ w2 + b2
    out = out @ w3 + b3
    logp = jax.nn.log_softmax(out, axis=-1)
    sim_rows = similarity_matrix[y]
    s = jnp.sum(logp * sim_rows, axis=1)
    avg = jnp.mean(s)
    loss = -avg / jnp.sum(similarity_matrix)
    return loss, out


# -------------------- main --------------------

if __name__ == "__main__":
    key = jax.random.PRNGKey(0)
    k = jax.random.split(key, 8)

    B = 2
    IN = 512                 # fixed by nn.Linear(512, layer_size_1)
    L1 = 64                  # layer_size_1
    L2 = 32                  # layer_size_2
    NUM_CLASSES = 16

    # Deterministic parameter init (weights stored as (in, out)).
    w1 = jax.random.normal(k[0], (IN, L1), jnp.float32) * 0.02
    b1 = jax.random.normal(k[1], (1, L1), jnp.float32) * 0.02
    w2 = jax.random.normal(k[2], (L1, L2), jnp.float32) * 0.02
    b2 = jax.random.normal(k[3], (1, L2), jnp.float32) * 0.02
    w3 = jax.random.normal(k[4], (L2, NUM_CLASSES), jnp.float32) * 0.02
    b3 = jax.random.normal(k[5], (1, NUM_CLASSES), jnp.float32) * 0.02
    params = (w1, b1, w2, b2, w3, b3)

    similarity_matrix = jax.random.uniform(k[6], (NUM_CLASSES, NUM_CLASSES), jnp.float32)

    x = jax.random.normal(k[7], (B, 1, IN), jnp.float32)
    y = jnp.array([3, 7], dtype=jnp.int32)

    ref_loss, ref_logits = _reference(x, params, similarity_matrix, y)

    # f32 compute path (exactness check).
    logits_only_f32 = clap_classifier_forward(x, params, similarity_matrix, y=None,
                                              compute_dtype=jnp.float32)
    loss_f32, logits_f32 = clap_classifier_forward(x, params, similarity_matrix, y=y,
                                                   compute_dtype=jnp.float32)
    jax.block_until_ready((logits_only_f32, loss_f32, logits_f32))
    assert jnp.allclose(logits_only_f32, ref_logits, atol=1e-5, rtol=1e-5)
    assert jnp.allclose(logits_f32, ref_logits, atol=1e-5, rtol=1e-5)
    assert jnp.allclose(loss_f32, ref_loss, atol=1e-5, rtol=1e-5)

    # bf16 MXU-operand path (default, perf-optimized; f32 accumulation).
    logits_only_bf16 = clap_classifier_forward(x, params, similarity_matrix, y=None)
    loss_bf16, logits_bf16 = clap_classifier_forward(x, params, similarity_matrix, y=y)
    jax.block_until_ready((logits_only_bf16, loss_bf16, logits_bf16))
    assert jnp.allclose(logits_only_bf16, ref_logits, atol=2e-2, rtol=2e-2)
    assert jnp.allclose(logits_bf16, ref_logits, atol=2e-2, rtol=2e-2)
    assert jnp.allclose(loss_bf16, ref_loss, atol=2e-2, rtol=2e-2)

    print("KERNEL_OK")
</pallas_src>

<mosaic_0001>
module attributes {stable_mosaic.version = 11 : i64} {
  func.func @mlp_kernel(%arg0: i32, %arg1: memref<8x512xf32, #tpu.memory_space<vmem>>, %arg2: memref<512x64xf32, #tpu.memory_space<vmem>>, %arg3: memref<1x64xf32, #tpu.memory_space<vmem>>, %arg4: memref<64x32xf32, #tpu.memory_space<vmem>>, %arg5: memref<1x32xf32, #tpu.memory_space<vmem>>, %arg6: memref<32x16xf32, #tpu.memory_space<vmem>>, %arg7: memref<1x16xf32, #tpu.memory_space<vmem>>, %arg8: memref<8x16xf32, #tpu.memory_space<vmem>>) attributes {dimension_semantics = [#tpu.dimension_semantics<parallel>], iteration_bounds = array<i64: 1>, scalar_prefetch = 0 : i64, scratch_operands = 0 : i64, tpu.core_type = #tpu.core_type<tc>, window_params = [{transform_indices = @transform_0, window_bounds = array<i64: 8, 512>}, {pipeline_mode = #tpu.pipeline_mode<synchronous>, transform_indices = @transform_1, window_bounds = array<i64: 512, 64>}, {pipeline_mode = #tpu.pipeline_mode<synchronous>, transform_indices = @transform_2, window_bounds = array<i64: 1, 64>}, {pipeline_mode = #tpu.pipeline_mode<synchronous>, transform_indices = @transform_3, window_bounds = array<i64: 64, 32>}, {pipeline_mode = #tpu.pipeline_mode<synchronous>, transform_indices = @transform_4, window_bounds = array<i64: 1, 32>}, {pipeline_mode = #tpu.pipeline_mode<synchronous>, transform_indices = @transform_5, window_bounds = array<i64: 32, 16>}, {pipeline_mode = #tpu.pipeline_mode<synchronous>, transform_indices = @transform_6, window_bounds = array<i64: 1, 16>}, {transform_indices = @transform_7, window_bounds = array<i64: 8, 16>}]} {
    %c0 = arith.constant 0 : index
    %c0_0 = arith.constant 0 : index
    %0 = vector.load %arg1[%c0, %c0_0] : memref<8x512xf32, #tpu.memory_space<vmem>>, vector<8x512xf32>
    %c0_1 = arith.constant 0 : index
    %c0_2 = arith.constant 0 : index
    %1 = vector.load %arg2[%c0_1, %c0_2] : memref<512x64xf32, #tpu.memory_space<vmem>>, vector<512x64xf32>
    %cst = arith.constant dense<0.000000e+00> : vector<8x64xf32>
    %2 = tpu.matmul %0, %1, %cst {dimension_numbers = #tpu.dot_dimension_numbers<[1], [0], [0], [1], [0, 0, 1, 1], [], []>} : vector<8x512xf32>, vector<512x64xf32>, vector<8x64xf32> -> vector<8x64xf32>
    %c0_3 = arith.constant 0 : index
    %c0_4 = arith.constant 0 : index
    %3 = vector.load %arg3[%c0_3, %c0_4] : memref<1x64xf32, #tpu.memory_space<vmem>>, vector<1x64xf32>
    %4 = vector.broadcast %3 : vector<1x64xf32> to vector<8x64xf32>
    %5 = arith.addf %2, %4 : vector<8x64xf32>
    %c0_5 = arith.constant 0 : index
    %c0_6 = arith.constant 0 : index
    %6 = vector.load %arg4[%c0_5, %c0_6] : memref<64x32xf32, #tpu.memory_space<vmem>>, vector<64x32xf32>
    %cst_7 = arith.constant dense<0.000000e+00> : vector<8x32xf32>
    %7 = tpu.matmul %5, %6, %cst_7 {dimension_numbers = #tpu.dot_dimension_numbers<[1], [0], [0], [1], [0, 0, 1, 1], [], []>} : vector<8x64xf32>, vector<64x32xf32>, vector<8x32xf32> -> vector<8x32xf32>
    %c0_8 = arith.constant 0 : index
    %c0_9 = arith.constant 0 : index
    %8 = vector.load %arg5[%c0_8, %c0_9] : memref<1x32xf32, #tpu.memory_space<vmem>>, vector<1x32xf32>
    %9 = vector.broadcast %8 : vector<1x32xf32> to vector<8x32xf32>
    %10 = arith.addf %7, %9 : vector<8x32xf32>
    %c0_10 = arith.constant 0 : index
    %c0_11 = arith.constant 0 : index
    %11 = vector.load %arg6[%c0_10, %c0_11] : memref<32x16xf32, #tpu.memory_space<vmem>>, vector<32x16xf32>
    %cst_12 = arith.constant dense<0.000000e+00> : vector<8x16xf32>
    %12 = tpu.matmul %10, %11, %cst_12 {dimension_numbers = #tpu.dot_dimension_numbers<[1], [0], [0], [1], [0, 0, 1, 1], [], []>} : vector<8x32xf32>, vector<32x16xf32>, vector<8x16xf32> -> vector<8x16xf32>
    %c0_13 = arith.constant 0 : index
    %c0_14 = arith.constant 0 : index
    %13 = vector.load %arg7[%c0_13, %c0_14] : memref<1x16xf32, #tpu.memory_space<vmem>>, vector<1x16xf32>
    %14 = vector.broadcast %13 : vector<1x16xf32> to vector<8x16xf32>
    %15 = arith.addf %12, %14 : vector<8x16xf32>
    %c0_15 = arith.constant 0 : index
    %c0_16 = arith.constant 0 : index
    %16 = vector.load %arg8[%c0_15, %c0_16] : memref<8x16xf32, #tpu.memory_space<vmem>>, vector<8x16xf32>
    tpu.vector_store %arg8[%c0_15, %c0_16], %15 {strides = array<i32>} : memref<8x16xf32, #tpu.memory_space<vmem>>, vector<8x16xf32>,
    return
  }
  func.func @transform_0(%arg0: i32) -> (i32, i32) {
    %c0_i32 = arith.constant 0 : i32
    %c0_i32_0 = arith.constant 0 : i32
    return %arg0, %c0_i32 : i32, i32
  }
  func.func @transform_1(%arg0: i32) -> (i32, i32) {
    %c0_i32 = arith.constant 0 : i32
    %c0_i32_0 = arith.constant 0 : i32
    %c0_i32_1 = arith.constant 0 : i32
    return %c0_i32, %c0_i32_0 : i32, i32
  }
  func.func @transform_2(%arg0: i32) -> (i32, i32) {
    %c0_i32 = arith.constant 0 : i32
    %c0_i32_0 = arith.constant 0 : i32
    %c0_i32_1 = arith.constant 0 : i32
    return %c0_i32, %c0_i32_0 : i32, i32
  }
  func.func @transform_3(%arg0: i32) -> (i32, i32) {
    %c0_i32 = arith.constant 0 : i32
    %c0_i32_0 = arith.constant 0 : i32
    %c0_i32_1 = arith.constant 0 : i32
    return %c0_i32, %c0_i32_0 : i32, i32
  }
  func.func @transform_4(%arg0: i32) -> (i32, i32) {
    %c0_i32 = arith.constant 0 : i32
    %c0_i32_0 = arith.constant 0 : i32
    %c0_i32_1 = arith.constant 0 : i32
    return %c0_i32, %c0_i32_0 : i32, i32
  }
  func.func @transform_5(%arg0: i32) -> (i32, i32) {
    %c0_i32 = arith.constant 0 : i32
    %c0_i32_0 = arith.constant 0 : i32
    %c0_i32_1 = arith.constant 0 : i32
    return %c0_i32, %c0_i32_0 : i32, i32
  }
  func.func @transform_6(%arg0: i32) -> (i32, i32) {
    %c0_i32 = arith.constant 0 : i32
    %c0_i32_0 = arith.constant 0 : i32
    %c0_i32_1 = arith.constant 0 : i32
    return %c0_i32, %c0_i32_0 : i32, i32
  }
  func.func @transform_7(%arg0: i32) -> (i32, i32) {
    %c0_i32 = arith.constant 0 : i32
    %c0_i32_0 = arith.constant 0 : i32
    return %arg0, %c0_i32 : i32, i32
  }
}

</mosaic_0001>

<bundles_post_ra>
// kernel: tpu_custom_call.1
= control target key start
LH: loop header
LB: loop body
LE: loop exit
PB: predicated region body
PF: predicated region fallthrough
CT: control target
= control target key end

     0   :  { %s966_s0 = inlined_call_operand.vmem [shape: f32[8,512], index: 0, kind: input, shape index: {}]   ;;  %s967_s1 = inlined_call_operand.vmem [shape: f32[512,64], index: 1, kind: input, shape index: {}]   ;;  %s968_s2 = inlined_call_operand.vmem [shape: f32[1,64], index: 2, kind: input, shape index: {}]   ;;  %s969_s3 = inlined_call_operand.vmem [shape: f32[64,32], index: 3, kind: input, shape index: {}]   ;;  %s970_s4 = inlined_call_operand.vmem [shape: f32[1,32], index: 4, kind: input, shape index: {}]   ;;  %s971_s5 = inlined_call_operand.vmem [shape: f32[32,16], index: 5, kind: input, shape index: {}]   ;;  %s972_s6 = inlined_call_operand.vmem [shape: f32[1,16], index: 6, kind: input, shape index: {}]   ;;  %s973_s7 = inlined_call_operand.hbm [shape: f32[8,16], index: 7, kind: output, shape index: {}]  }
   0x1   :  { %v47_v0 = vld [vmem:[%s967_s1 + $0x80] sm:$0xff]  ;;  %v48_v1 = vld [vmem:[%s967_s1 + $0x88] sm:$0xff]  ;;  %v49_v11 = vld [vmem:[%s967_s1 + $0x90] sm:$0xff] }
   0x2   :  { %v31_v2 = vld [vmem:[%s967_s1] sm:$0xff]  ;;  %v551_v3 = vpack.c.bf16 %v48_v1, %v47_v0  ;;  %v32_v4 = vld [vmem:[%s967_s1 + $0x8] sm:$0xff]  ;;  %v50_v13 = vld [vmem:[%s967_s1 + $0x98] sm:$0xff] }
   0x3   :  { %v79_v5 = vld [vmem:[%s967_s1 + $0x180] sm:$0xff]  ;;  %v80_v6 = vld [vmem:[%s967_s1 + $0x188] sm:$0xff]  ;;  %v553_v7 = vpack.c.bf16 %v32_v4, %v31_v2  ;;  %v33_v14 = vld [vmem:[%s967_s1 + $0x10] sm:$0xff]  ;;  %v555_v16 = vpack.c.bf16 %v50_v13, %v49_v11 }
   0x4   :  { %v583_v8 = vpack.c.bf16 %v80_v6, %v79_v5  ;;  %v63_v9 = vld [vmem:[%s967_s1 + $0x100] sm:$0xff]  ;;  %v64_v10 = vld [vmem:[%s967_s1 + $0x108] sm:$0xff]  ;;  %552 = vmatprep.subr.bf16.mxu0 %v551_v3  ;;  %v34_v15 = vld [vmem:[%s967_s1 + $0x18] sm:$0xff] }
   0x5   :  { %v585_v12 = vpack.c.bf16 %v64_v10, %v63_v9  ;;  %554 = vmatpush3.bf16.msra.mxu0 %v553_v7  ;;  %v557_v17 = vpack.c.bf16 %v34_v15, %v33_v14  ;;  %v81_v18 = vld [vmem:[%s967_s1 + $0x190] sm:$0xff]  ;;  %v82_v19 = vld [vmem:[%s967_s1 + $0x198] sm:$0xff]  ;;  %v51_v23 = vld [vmem:[%s967_s1 + $0xa0] sm:$0xff] }
   0x6   :  { %584 = vmatprep.subr.bf16.mxu1 %v583_v8  ;;  %v65_v20 = vld [vmem:[%s967_s1 + $0x110] sm:$0xff]  ;;  %v587_v21 = vpack.c.bf16 %v82_v19, %v81_v18  ;;  %v66_v22 = vld [vmem:[%s967_s1 + $0x118] sm:$0xff]  ;;  %v52_v24 = vld [vmem:[%s967_s1 + $0xa8] sm:$0xff]  ;;  %556 = vmatprep.subr.bf16.mxu0 %v555_v16 }
   0x7   :  { %586 = vmatpush3.bf16.msra.mxu1 %v585_v12  ;;  %v589_v25 = vpack.c.bf16 %v66_v22, %v65_v20  ;;  %v559_v26 = vpack.c.bf16 %v52_v24, %v51_v23  ;;  %v35_v27 = vld [vmem:[%s967_s1 + $0x20] sm:$0xff]  ;;  %v36_v28 = vld [vmem:[%s967_s1 + $0x28] sm:$0xff]  ;;  %v53_v35 = vld [vmem:[%s967_s1 + $0xb0] sm:$0xff] }
   0x8   :  { %v83_v29 = vld [vmem:[%s967_s1 + $0x1a0] sm:$0xff]  ;;  %588 = vmatprep.subr.bf16.mxu1 %v587_v21  ;;  %v84_v30 = vld [vmem:[%s967_s1 + $0x1a8] sm:$0xff]  ;;  %v561_v33 = vpack.c.bf16 %v36_v28, %v35_v27  ;;  %v54_v36 = vld [vmem:[%s967_s1 + $0xb8] sm:$0xff] }
   0x9   :  { %v67_v31 = vld [vmem:[%s967_s1 + $0x120] sm:$0xff]  ;;  %v68_v32 = vld [vmem:[%s967_s1 + $0x128] sm:$0xff]  ;;  %558 = vmatpush3.bf16.msra.mxu0 %v557_v17  ;;  %v591_v34 = vpack.c.bf16 %v84_v30, %v83_v29  ;;  %v37_v37 = vld [vmem:[%s967_s1 + $0x30] sm:$0xff]  ;;  %v563_v39 = vpack.c.bf16 %v54_v36, %v53_v35 }
   0xa   :  { %560 = vmatprep.subr.bf16.mxu0 %v559_v26  ;;  %v593_v38 = vpack.c.bf16 %v68_v32, %v67_v31  ;;  %v38_v40 = vld [vmem:[%s967_s1 + $0x38] sm:$0xff]  ;;  %v85_v41 = vld [vmem:[%s967_s1 + $0x1b0] sm:$0xff]  ;;  %v55_v46 = vld [vmem:[%s967_s1 + $0xc0] sm:$0xff] }
   0xb   :  { %590 = vmatpush3.bf16.msra.mxu1 %v589_v25  ;;  %v86_v42 = vld [vmem:[%s967_s1 + $0x1b8] sm:$0xff]  ;;  %v69_v44 = vld [vmem:[%s967_s1 + $0x130] sm:$0xff]  ;;  %v56_v47 = vld [vmem:[%s967_s1 + $0xc8] sm:$0xff]  ;;  %v565_v48 = vpack.c.bf16 %v38_v40, %v37_v37 }
   0xc   :  { %592 = vmatprep.subr.bf16.mxu1 %v591_v34  ;;  %v595_v43 = vpack.c.bf16 %v86_v42, %v85_v41  ;;  %v70_v45 = vld [vmem:[%s967_s1 + $0x138] sm:$0xff]  ;;  %v87_v49 = vld [vmem:[%s967_s1 + $0x1c0] sm:$0xff]  ;;  %v88_v50 = vld [vmem:[%s967_s1 + $0x1c8] sm:$0xff]  ;;  %v567_v52 = vpack.c.bf16 %v56_v47, %v55_v46 }
   0xd   :  { %562 = vmatpush3.bf16.msra.mxu0 %v561_v33  ;;  %v597_v51 = vpack.c.bf16 %v70_v45, %v69_v44  ;;  %v39_v53 = vld [vmem:[%s967_s1 + $0x40] sm:$0xff]  ;;  %v40_v54 = vld [vmem:[%s967_s1 + $0x48] sm:$0xff]  ;;  %v599_v56 = vpack.c.bf16 %v88_v50, %v87_v49  ;;  %v57_v58 = vld [vmem:[%s967_s1 + $0xd0] sm:$0xff] }
   0xe   :  { %564 = vmatprep.subr.bf16.mxu0 %v563_v39  ;;  %v71_v55 = vld [vmem:[%s967_s1 + $0x140] sm:$0xff]  ;;  %v72_v57 = vld [vmem:[%s967_s1 + $0x148] sm:$0xff]  ;;  %v58_v59 = vld [vmem:[%s967_s1 + $0xd8] sm:$0xff]  ;;  %v569_v62 = vpack.c.bf16 %v40_v54, %v39_v53 }
   0xf   :  { %594 = vmatpush3.bf16.msra.mxu1 %v593_v38  ;;  %v89_v60 = vld [vmem:[%s967_s1 + $0x1d0] sm:$0xff]  ;;  %v90_v61 = vld [vmem:[%s967_s1 + $0x1d8] sm:$0xff]  ;;  %v601_v63 = vpack.c.bf16 %v72_v57, %v71_v55  ;;  %v571_v0 = vpack.c.bf16 %v58_v59, %v57_v58  ;;  %v59_v6 = vld [vmem:[%s967_s1 + $0xe0] sm:$0xff] }
  0x10   :  { %596 = vmatprep.subr.bf16.mxu1 %v595_v43  ;;  %v41_v1 = vld [vmem:[%s967_s1 + $0x50] sm:$0xff]  ;;  %v42_v2 = vld [vmem:[%s967_s1 + $0x58] sm:$0xff]  ;;  %v603_v4 = vpack.c.bf16 %v90_v61, %v89_v60  ;;  %v60_v7 = vld [vmem:[%s967_s1 + $0xe8] sm:$0xff] }
  0x11   :  { %566 = vmatpush3.bf16.msra.mxu0 %v565_v48  ;;  %v73_v3 = vld [vmem:[%s967_s1 + $0x150] sm:$0xff]  ;;  %v74_v5 = vld [vmem:[%s967_s1 + $0x158] sm:$0xff]  ;;  %v91_v8 = vld [vmem:[%s967_s1 + $0x1e0] sm:$0xff]  ;;  %v573_v10 = vpack.c.bf16 %v42_v2, %v41_v1  ;;  %v575_v14 = vpack.c.bf16 %v60_v7, %v59_v6 }
  0x12   :  { %568 = vmatprep.subr.bf16.mxu0 %v567_v52  ;;  %v92_v9 = vld [vmem:[%s967_s1 + $0x1e8] sm:$0xff]  ;;  %v43_v11 = vld [vmem:[%s967_s1 + $0x60] sm:$0xff]  ;;  %v605_v13 = vpack.c.bf16 %v74_v5, %v73_v3  ;;  %v61_v19 = vld [vmem:[%s967_s1 + $0xf0] sm:$0xff] }
  0x13   :  { %598 = vmatpush3.bf16.msra.mxu1 %v597_v51  ;;  %v44_v12 = vld [vmem:[%s967_s1 + $0x68] sm:$0xff]  ;;  %v75_v15 = vld [vmem:[%s967_s1 + $0x160] sm:$0xff]  ;;  %v607_v18 = vpack.c.bf16 %v92_v9, %v91_v8  ;;  %v62_v20 = vld [vmem:[%s967_s1 + $0xf8] sm:$0xff] }
  0x14   :  { %600 = vmatprep.subr.bf16.mxu1 %v599_v56  ;;  %v76_v16 = vld [vmem:[%s967_s1 + $0x168] sm:$0xff]  ;;  %v30_v21 = vld [vmem:[%s966_s0 + $0x18] sm:$0xff]  ;;  %v93_v22 = vld [vmem:[%s967_s1 + $0x1f0] sm:$0xff]  ;;  %v577_v24 = vpack.c.bf16 %v44_v12, %v43_v11 }
  0x15   :  { %570 = vmatpush3.bf16.msra.mxu0 %v569_v62  ;;  %v28_v17 = vld [vmem:[%s966_s0 + $0x8] sm:$0xff]  ;;  %v94_v23 = vld [vmem:[%s967_s1 + $0x1f8] sm:$0xff]  ;;  %236 = vmatprep.mubr.f32.mxu1 %v30_v21 }
  0x16   :  { %572 = vmatprep.subr.bf16.mxu0 %v571_v0  ;;  %166 = vmatprep.mubr.f32.mxu0 %v28_v17 }
  0x17   :  { %602 = vmatpush3.bf16.msra.mxu1 %v601_v63 }
  0x18   :  { %604 = vmatprep.subr.bf16.mxu1 %v603_v4 }
  0x19   :  { %574 = vmatpush3.bf16.msra.mxu0 %v573_v10 }
  0x1a   :  { %12 = vsyncpa [#allocation3], 0  ;;  %576 = vmatprep.subr.bf16.mxu0 %v575_v14  ;;  %v609_v25 = vpack.c.bf16 %v76_v16, %v75_v15  ;;  %v579_v26 = vpack.c.bf16 %v62_v20, %v61_v19  ;;  %v45_v27 = vld [vmem:[%s967_s1 + $0x70] sm:$0xff]  ;;  %v46_v28 = vld [vmem:[%s967_s1 + $0x78] sm:$0xff]  ;;  %v611_v29 = vpack.c.bf16 %v94_v23, %v93_v22  ;;  %v661_v39 = vmov 0.0|0.0   ;;  %s664_s24 = smov [#allocation2]  }
  0x1b   :  { %606 = vmatpush3.bf16.msra.mxu1 %v605_v13  ;;  %v77_v30 = vld [vmem:[%s967_s1 + $0x170] sm:$0xff]  ;;  %v78_v31 = vld [vmem:[%s967_s1 + $0x178] sm:$0xff]  ;;  %v581_v32 = vpack.c.bf16 %v46_v28, %v45_v27  ;;  %v242_v34 = vld [vmem:[%s969_s3] sm:$0xff]  ;;  %vm662_vm0 = vmmov 0   ;;  %v663_v49 = vmov 0.0   ;;  %vm257_vm1 = vcmask 523264  }
  0x1c   :  { %608 = vmatprep.subr.bf16.mxu1 %v607_v18  ;;  %v613_v33 = vpack.c.bf16 %v78_v31, %v77_v30  ;;  %v243_v35 = vld [vmem:[%s969_s3 + $0x8] sm:$0xff]  ;;  %v27_v36 = vld [vmem:[%s966_s0] sm:$0xff]  ;;  %v29_v38 = vld [vmem:[%s966_s0 + $0x10] sm:$0xff]  ;;  %vm342_vm2 = vcmask 261120   ;;  %s424_s25 = sshll.u32 %s664_s24, 4  ;;  %vm416_vm3 = vcmask 130048   ;;  %s425_s25 = int_to_ptr.vmem [resolvable:$true] %s424_s25 }
  0x1d   :  { %578 = vmatpush3.bf16.msra.mxu0 %v577_v24  ;;  %v616_v37 = vpack.c.bf16 %v243_v35, %v242_v34  ;;  %v244_v40 = vld [vmem:[%s969_s3 + $0x10] sm:$0xff]  ;;  %v245_v41 = vld [vmem:[%s969_s3 + $0x18] sm:$0xff]  ;;  %v246_v43 = vld [vmem:[%s969_s3 + $0x20] sm:$0xff]  ;;  %p642_p1 = scmp.lt.s32.totalorder %s425_s25, %s425_s25 }
  0x1e   :  { %580 = vmatprep.subr.bf16.mxu0 %v579_v26  ;;  %v619_v42 = vpack.c.bf16 %v245_v41, %v244_v40  ;;  %v247_v44 = vld [vmem:[%s969_s3 + $0x28] sm:$0xff]  ;;  %v248_v46 = vld [vmem:[%s969_s3 + $0x30] sm:$0xff]  ;;  %v249_v47 = vld [vmem:[%s969_s3 + $0x38] sm:$0xff] }
  0x1f   :  { %610 = vmatpush3.bf16.msra.mxu1 %v609_v25  ;;  %v622_v45 = vpack.c.bf16 %v247_v44, %v246_v43  ;;  %v625_v48 = vpack.c.bf16 %v249_v47, %v248_v46  ;;  %v331_v50 = vld [vmem:[%s971_s5] sm:$0xff]  ;;  %v332_v51 = vld [vmem:[%s971_s5 + $0x8] sm:$0xff]  ;;  %v333_v62 = vld [vmem:[%s971_s5 + $0x10] sm:$0xff] }
  0x20   :  { %612 = vmatprep.subr.bf16.mxu1 %v611_v29  ;;  %v628_v52 = vpack.c.bf16 %v332_v51, %v331_v50  ;;  %v432_v54 = vld [vmem:[%s968_s2] ss:$0 sm:$0xff]  ;;  %v334_v63 = vld [vmem:[%s971_s5 + $0x18] sm:$0xff]  ;;  %s637_s5 = scalar_lea.vmem %s425_s25, 128 }
  0x21   :  { %582 = vmatpush3.bf16.msra.mxu0 %v581_v32  ;;  %v631_v0 = vpack.c.bf16 %v334_v63, %v333_v62  ;;  %v433_v1 = vld [vmem:[%s970_s4] ss:$0 sm:$0xff]  ;;  %p638_p0 = scmp.ne.s32.totalorder %s425_s25, %s637_s5  ;;  %p643_p2 = scmp.lt.s32.totalorder %s637_s5, %s637_s5 }
  0x22   :  { %615 = vmatprep.subr.bf16.mxu0 %v661_v39  ;;  %v435_v5 = vld [vmem:[%s972_s6] ss:$0 sm:$0xff] }
  0x23   :  { %614 = vmatpush3.bf16.msra.mxu1 %v613_v33  ;;  %p644_p3 = por %p643_p2, %p642_p1 }
  0x24   :  { %627 = vmatprep.subr.bf16.mxu1 %v661_v39  ;;  %167 = vmatmul.mubr.f32.vlgmr.msra.gmra.mrb[0].mxu0 %v27_v36 }
  0x25   :  { %617 = vmatpush3.bf16.msra.mxu0 %v616_v37  ;;  %537 = vmatprep.mubr.msk.f32.mxu0 %vm662_vm0, %v663_v49  ;;  %p645_p4 = pnand %p644_p3, %p638_p0 }
  0x26   :  { %237 = vmatmul.mubr.f32.vlgmr.msra.gmra.mrb[0].mxu1 %v29_v38  ;;  %618 = vmatprep.subr.bf16.mxu0 %v661_v39 }
  0x27   :  { %548 = vmatprep.mubr.msk.f32.mxu1 %vm662_vm0, %v663_v49  ;;  %629 = vmatpush3.bf16.msra.mxu1 %v628_v52 }
  0x28   :  { %630 = vmatprep.subr.bf16.mxu1 %v661_v39 }
  0x29   :  { %620 = vmatpush3.bf16.msra.mxu0 %v619_v42 }
  0x2a   :  { %621 = vmatprep.subr.bf16.mxu0 %v661_v39 }
  0x2b   :  { %632 = vmatpush3.bf16.msra.mxu1 %v631_v0 }
  0x2d   :  { %623 = vmatpush3.bf16.msra.mxu0 %v622_v45 }
  0x2e   :  { %624 = vmatprep.subr.bf16.mxu0 %v661_v39 }
  0x31   :  { %626 = vmatpush3.bf16.msra.mxu0 %v625_v48 }
  0xf7   :  { %v469_v53 = vpop.f32.mrb[0].mxu0 }
  0xf8   :  { %v470_v55 = vpop.f32.mrb[1].mxu0 }
  0xf9   :  { %v504_v56 = vpop.f32.mrb[0].mxu1  ;;  %v471_v57 = vadd.f32 %v470_v55, %v469_v53 }
  0xfa   :  { %v505_v58 = vpop.f32.mrb[1].mxu1 }
  0xfb   :  { %v506_v59 = vadd.f32 %v505_v58, %v504_v56  ;;  %v169_v60 = vadd.f32 %v471_v57, %v432_v54 }
  0xfd   :  { %v239_v61 = vadd.f32 %v506_v59, %v169_v60 }
  0xff   :  { %538 = vmatmul.mubr.msk.f32.vlgmr.msra.gmra.mrb[2].mxu0 %vm257_vm1, %v239_v61 }
 0x1d2   :  { %v327_v2 = vpop.f32.mrb[2].mxu0 }
 0x1d3   :  { %v328_v3 = vadd.f32 %v433_v1, %v327_v2  ;;  %v539_v4 = vpop.f32.mrb[3].mxu0 }
 0x1d5   :  { %549 = vmatmul.mubr.msk.f32.vlgmr.msra.gmra.mrb[2].mxu1 %vm342_vm2, %v328_v3 }
 0x2a8   :  { %v412_v6 = vpop.f32.mrb[2].mxu1 }
 0x2a9   :  { %v413_v7 = vadd.f32 %v435_v5, %v412_v6  ;;  %v550_v8 = vpop.f32.mrb[3].mxu1 }
 0x2ab   :  { %417 = vst.msk [vmem:[#allocation2] sm:$0xff] %vm416_vm3, %v413_v7 }
 0x2ac   :  { %648 = shalt.err (!%p645_p4)
}
 0x2ad   :  { %s649_s27 = scalar_lea.hbm %s973_s7, 128 }
 0x2ae   :  { %p650_p5 = scmp.ne.s32.totalorder %s973_s7, %s649_s27  ;;  %p653_p6 = scmp.lt.u32.totalorder %s649_s27, %s973_s7 }
 0x2b0   :  { %p655_p7 = pnand %p653_p6, %p650_p5 }
 0x2b2   :  { %658 = shalt.err (!%p655_p7)
}
 0x2b3   :  { %427 = dma.vmem_to_hbm [thread:$0]  %s425_s25, 128, %s973_s7, [#allocation3]  }
 0x2b4   :  { %659 = dma.done.wait [#allocation3], 128  }
 0x2b5   :  { %660 = vsyncadd [#allocation3], 4294967168 }
 0x2b6   :  { %431 = vsyncpa [#allocation3], 1 }

</bundles_post_ra>
